<compile_context>
chip_gen: v7x
topology: tpu7x:2x2x1
jax: 0.10.0
libtpu: 0.0.40
codegen_flags: <defaults>
</compile_context>

<pallas_src>
import functools

import jax
import jax.numpy as jnp
from jax import lax
from jax.experimental import pallas as pl
from jax.experimental.pallas import tpu as pltpu

_NEG = -1e30  # bias for padded logit lanes; exp() underflows to exactly 0.


def _round_up(v, m):
    return (v + m - 1) // m * m


def _cnn1d_kernel(x2_ref, w1c_ref, b1c_ref, w2c_ref, b2_ref, fcw_ref, fcb_ref,
                  out_ref, *, use_mxu_conv1):
    # x2_ref : (TB, 2, L2) f32   row 0 = x[2m] (even), row 1 = x[2m+1] (odd)
    # w1c_ref: (8, 2Hp)    f32   conv1 folded; cols [0:Hp]=even phase, [Hp:]=odd
    # b1c_ref: (1, 2Hp)    f32
    # w2c_ref: (3Hp, Op)   bf16  conv2 folded, rows = k*Hp + i
    # b2_ref : (1, Op)     f32
    # fcw_ref: (Op, Cp)    bf16  lane-padded fc weights
    # fcb_ref: (1, Cp)     f32   padded lanes = -1e30
    # out_ref: (TB, Cp)    f32
    TB, _, L2 = x2_ref.shape
    Hp = w1c_ref.shape[1] // 2
    Op = w2c_ref.shape[1]

    # ---- build the 4 conv1 taps, lane-dense on the position axis ------------
    xe = x2_ref[:, 0:1, :]                                      # (TB, 1, L2)
    xo = x2_ref[:, 1:2, :]                                      # (TB, 1, L2)
    z1 = jnp.zeros((TB, 1, 1), jnp.float32)
    xo_prev = jnp.concatenate([z1, xo[:, :, :L2 - 1]], axis=2)  # x[2m-1] (halo=0)
    xe_next = jnp.concatenate([xe[:, :, 1:], z1], axis=2)       # x[2m+2] (halo=0)
    zpad = jnp.zeros((TB, 4, L2), jnp.float32)
    taps_tl = jnp.concatenate([xo_prev, xe, xo, xe_next, zpad], axis=1)  # (TB,8,L2)
    # single small relayout: positions -> sublanes, taps -> lanes
    taps = jnp.transpose(taps_tl, (0, 2, 1))                    # (TB, L2, 8)

    # ---- stage 1: conv1(k=3,pad=1) + ReLU + MaxPool1d(2), even/odd fused ----
    if use_mxu_conv1:
        # One MXU matmul produces both phases; pool = max of the two halves.
        c = jnp.einsum('blt,tc->blc', taps.astype(jnp.bfloat16),
                       w1c_ref[...].astype(jnp.bfloat16),
                       preferred_element_type=jnp.float32)       # (TB, L2, 2Hp)
        c = c + b1c_ref[...]
        p = jnp.maximum(jnp.maximum(c[:, :, :Hp], c[:, :, Hp:]), 0.0)
    else:
        # v5e: keep conv1 on the VPU (the MXU is the binding unit there).
        w = w1c_ref[...]
        b1 = b1c_ref[0:1, 0:Hp]
        c_even = (taps[:, :, 0:1] * w[0:1, :Hp] + taps[:, :, 1:2] * w[1:2, :Hp]
                  + taps[:, :, 2:3] * w[2:3, :Hp] + b1)
        c_odd = (taps[:, :, 1:2] * w[1:2, Hp:] + taps[:, :, 2:3] * w[2:3, Hp:]
                 + taps[:, :, 3:4] * w[3:4, Hp:] + b1)
        p = jnp.maximum(jnp.maximum(c_even, c_odd), 0.0)         # (TB, L2, Hp)

    # ---- stage 2: conv2 (k=3, pad=1) folded into ONE bf16 MXU matmul --------
    pb = p.astype(jnp.bfloat16)
    zrow = jnp.zeros((TB, 1, Hp), jnp.bfloat16)
    p_prev = jnp.concatenate([zrow, pb[:, :L2 - 1, :]], axis=1)
    p_next = jnp.concatenate([pb[:, 1:, :], zrow], axis=1)
    p_cat = jnp.concatenate([p_prev, pb, p_next], axis=-1)       # (TB, L2, 3Hp)
    w2 = w2c_ref[...]
    if L2 % 8 == 0:
        # flattened contraction: one accumulation chain, M = TB*L2 (layout-free merge)
        y = jnp.dot(p_cat.reshape(TB * L2, 3 * Hp), w2,
                    preferred_element_type=jnp.float32).reshape(TB, L2, Op)
    else:
        y = jnp.einsum('blk,ko->blo', p_cat, w2,
                       preferred_element_type=jnp.float32)

    # ---- MaxPool1d(2) + AdaptiveMaxPool1d(1): global max over valid prefix --
    # conv2 bias + ReLU commute with the max, so apply them on (TB, Op) only.
    Lv = 2 * (L2 // 2)
    g = jnp.max(y[:, :Lv, :], axis=1)                            # (TB, Op)
    g = jnp.maximum(g + b2_ref[...], 0.0)

    # ---- dropout(eval) + fc + log_softmax on a lane-dense (TB, Cp) block ----
    # TODO(synk): nn.Dropout train-mode stochastic masking not implemented;
    # eval-mode (identity) semantics are used here.
    z = jnp.dot(g.astype(jnp.bfloat16), fcw_ref[...],
                preferred_element_type=jnp.float32) + fcb_ref[...]
    z = z - jnp.max(z, axis=1, keepdims=True)
    z = z - jnp.log(jnp.sum(jnp.exp(z), axis=1, keepdims=True))
    out_ref[...] = z


def _pick_batch_tile(batch, l2, hp, op, vmem_budget_bytes):
    """Largest multiple-of-8 batch tile whose live intermediates fit the budget."""
    l2p = max(128, _round_up(l2, 128))
    per_row = (
        200 * l2p                       # lane-dense input phases / shifted copies (f32)
        + 800 * l2                      # transposed tap tensor, 128-lane padded
        + l2 * (24 * hp + 4 * op)       # conv1 out (f32), p (f32), p_cat (bf16), conv2 out (f32)
    )
    per_row = int(per_row * 1.5)        # relayout temporaries + pipelining headroom
    tb = (vmem_budget_bytes // max(per_row, 1)) // 8 * 8
    tb = max(8, min(tb, 1024))
    return min(tb, _round_up(batch, 8))


def cnn1d_forward(x, kernel_params, num_classes):
    w1c, b1c, w2c, b2c, fcw, fcb = kernel_params
    B, L = x.shape
    if L % 2 != 0 or L < 4:
        raise ValueError("cnn1d_forward requires an even sequence length >= 4")
    L2 = L // 2
    Hp = w1c.shape[1] // 2
    Op = w2c.shape[1]
    Cp = fcw.shape[1]

    # Per-generation VMEM budget: v7x has 64 MiB/TensorCore, v4/v5/v6 have 128 MiB.
    kind = jax.devices()[0].device_kind.lower()
    if "v7" in kind:
        vmem_phys = 64 << 20
    elif any(t in kind for t in ("v4", "v5", "v6")):
        vmem_phys = 128 << 20
    else:
        vmem_phys = 32 << 20            # conservative fallback for unknown chips
    use_mxu_conv1 = "v5" not in kind    # v5e: conv1 stays on the VPU (MXU binds there)

    TB = _pick_batch_tile(B, L2, Hp, Op, int(vmem_phys * 0.45))
    B_pad = _round_up(B, TB)
    if B_pad != B:
        x = jnp.pad(x, ((0, B_pad - B), (0, 0)))

    # Layout plumbing only (cheap XLA views): de-interleave even/odd samples so
    # MaxPool1d(2) after conv1 is an elementwise max of two phases, keeping the
    # position axis lane-dense for the input DMA.
    x2 = jnp.stack([x[:, 0::2], x[:, 1::2]], axis=1)            # (B_pad, 2, L2)

    const2 = lambda b: (0, 0)
    out_p = pl.pallas_call(
        functools.partial(_cnn1d_kernel, use_mxu_conv1=use_mxu_conv1),
        out_shape=jax.ShapeDtypeStruct((B_pad, Cp), jnp.float32),
        grid=(B_pad // TB,),
        in_specs=[
            pl.BlockSpec((TB, 2, L2), lambda b: (b, 0, 0)),
            pl.BlockSpec((8, 2 * Hp), const2),
            pl.BlockSpec((1, 2 * Hp), const2),
            pl.BlockSpec((3 * Hp, Op), const2),
            pl.BlockSpec((1, Op), const2),
            pl.BlockSpec((Op, Cp), const2),
            pl.BlockSpec((1, Cp), const2),
        ],
        out_specs=pl.BlockSpec((TB, Cp), lambda b: (b, 0)),
        compiler_params=pltpu.CompilerParams(
            dimension_semantics=("parallel",),
            vmem_limit_bytes=int(vmem_phys * 0.85)),
    )(x2, w1c, b1c, w2c, b2c, fcw, fcb)
    return out_p[:B, :num_classes]


def init_params(key, hidden_dim, num_classes):
    """Deterministic synthetic parameters in PyTorch layouts, plus kernel repack."""
    H, O, C = hidden_dim, 2 * hidden_dim, num_classes
    ks = jax.random.split(key, 6)
    conv1_w = jax.random.normal(ks[0], (H, 1, 3), jnp.float32) * 0.1   # (out, in, k)
    conv1_b = jax.random.normal(ks[1], (H,), jnp.float32) * 0.1
    conv2_w = jax.random.normal(ks[2], (O, H, 3), jnp.float32) * 0.1   # (out, in, k)
    conv2_b = jax.random.normal(ks[3], (O,), jnp.float32) * 0.1
    fc_w = jax.random.normal(ks[4], (C, O), jnp.float32) * 0.1          # (out, in)
    fc_b = jax.random.normal(ks[5], (C,), jnp.float32) * 0.1
    torch_params = (conv1_w, conv1_b, conv2_w, conv2_b, fc_w, fc_b)

    # Channel padding to 128-lane multiples keeps every concat/slice tile-aligned
    # and every MXU K/N dimension 128-aligned.  Padded channels are exact zeros.
    Hp = _round_up(H, 128)
    Op = _round_up(O, 128)
    Cp = _round_up(C, 128)

    # conv1 folded into an (8, 2Hp) matrix over the 4 taps
    # [x[2m-1], x[2m], x[2m+1], x[2m+2]] (+4 zero rows): columns [0:Hp] are the
    # even output phase, columns [Hp:2Hp] the odd phase.
    w1_kh = jnp.transpose(conv1_w[:, 0, :], (1, 0))            # (3, H): w1_kh[k, h]
    w1c = jnp.zeros((8, 2 * Hp), jnp.float32)
    w1c = w1c.at[0:3, :H].set(w1_kh)                           # even: taps 0,1,2
    w1c = w1c.at[1:4, Hp:Hp + H].set(w1_kh)                    # odd : taps 1,2,3
    b1c = jnp.zeros((1, 2 * Hp), jnp.float32)
    b1c = b1c.at[0, :H].set(conv1_b).at[0, Hp:Hp + H].set(conv1_b)

    # conv2 folded: row index = k*Hp + i (i = input channel), column = out channel.
    w2 = jnp.transpose(conv2_w, (2, 1, 0))                     # (3, H, O): w2[k, i, o]
    w2c = jnp.zeros((3 * Hp, Op), jnp.float32)
    for k in range(3):
        w2c = w2c.at[k * Hp:k * Hp + H, :O].set(w2[k])
    w2c = w2c.astype(jnp.bfloat16)                             # bf16 MXU weights
    b2c = jnp.zeros((1, Op), jnp.float32).at[0, :O].set(conv2_b)

    # Lane-dense fc: pad classes to a multiple of 128; padded columns get zero
    # weights and a -1e30 bias so they never affect log_softmax.
    fcw = jnp.zeros((Op, Cp), jnp.float32).at[:O, :C].set(jnp.transpose(fc_w, (1, 0)))
    fcw = fcw.astype(jnp.bfloat16)
    fcb = jnp.full((1, Cp), _NEG, jnp.float32).at[0, :C].set(fc_b)

    kernel_params = (w1c, b1c, w2c, b2c, fcw, fcb)
    return torch_params, kernel_params


def reference_forward(x, torch_params):
    """Pure-JAX reference mirroring the PyTorch forward (NCL layout)."""
    conv1_w, conv1_b, conv2_w, conv2_b, fc_w, fc_b = torch_params
    y = x[:, None, :]                                             # unsqueeze(1) -> (B,1,L)
    y = lax.conv_general_dilated(y, conv1_w, (1,), [(1, 1)],
                                 dimension_numbers=('NCH', 'OIH', 'NCH'))
    y = y + conv1_b[None, :, None]
    y = jnp.maximum(y, 0.0)
    y = lax.reduce_window(y, -jnp.inf, lax.max, (1, 1, 2), (1, 1, 2), 'VALID')
    y = lax.conv_general_dilated(y, conv2_w, (1,), [(1, 1)],
                                 dimension_numbers=('NCH', 'OIH', 'NCH'))
    y = y + conv2_b[None, :, None]
    y = jnp.maximum(y, 0.0)
    y = lax.reduce_window(y, -jnp.inf, lax.max, (1, 1, 2), (1, 1, 2), 'VALID')
    y = jnp.max(y, axis=-1)                                       # AdaptiveMaxPool1d(1)+view
    y = y @ fc_w.T + fc_b
    return jax.nn.log_softmax(y, axis=1)


if __name__ == "__main__":
    B, L, hidden_dim, num_classes = 2, 16, 8, 10
    key = jax.random.PRNGKey(0)
    kx, kp = jax.random.split(key)
    x = jax.random.normal(kx, (B, L), jnp.float32)
    torch_params, kernel_params = init_params(kp, hidden_dim, num_classes)

    out = cnn1d_forward(x, kernel_params, num_classes)
    out = jax.block_until_ready(out)

    ref = reference_forward(x, torch_params)
    assert out.shape == (B, num_classes)
    # Tolerance accounts for bf16 MXU inputs/weights in the kernel vs f32 reference.
    if not bool(jnp.allclose(out, ref, atol=2e-2, rtol=2e-2)):
        raise AssertionError("Pallas output does not match pure-JAX reference")
    print("KERNEL_OK")
</pallas_src>

<mosaic_0001>
module attributes {stable_mosaic.version = 11 : i64} {
  func.func @_cnn1d_kernel(%arg0: i32, %arg1: memref<8x2x8xf32, #tpu.memory_space<vmem>>, %arg2: memref<8x256xf32, #tpu.memory_space<vmem>>, %arg3: memref<1x256xf32, #tpu.memory_space<vmem>>, %arg4: memref<384x128xbf16, #tpu.memory_space<vmem>>, %arg5: memref<1x128xf32, #tpu.memory_space<vmem>>, %arg6: memref<128x128xbf16, #tpu.memory_space<vmem>>, %arg7: memref<1x128xf32, #tpu.memory_space<vmem>>, %arg8: memref<8x128xf32, #tpu.memory_space<vmem>>) attributes {dimension_semantics = [#tpu.dimension_semantics<parallel>], iteration_bounds = array<i64: 1>, scalar_prefetch = 0 : i64, scratch_operands = 0 : i64, tpu.core_type = #tpu.core_type<tc>, window_params = [{transform_indices = @transform_0, window_bounds = array<i64: 8, 2, 8>}, {pipeline_mode = #tpu.pipeline_mode<synchronous>, transform_indices = @transform_1, window_bounds = array<i64: 8, 256>}, {pipeline_mode = #tpu.pipeline_mode<synchronous>, transform_indices = @transform_2, window_bounds = array<i64: 1, 256>}, {pipeline_mode = #tpu.pipeline_mode<synchronous>, transform_indices = @transform_3, window_bounds = array<i64: 384, 128>}, {pipeline_mode = #tpu.pipeline_mode<synchronous>, transform_indices = @transform_4, window_bounds = array<i64: 1, 128>}, {pipeline_mode = #tpu.pipeline_mode<synchronous>, transform_indices = @transform_5, window_bounds = array<i64: 128, 128>}, {pipeline_mode = #tpu.pipeline_mode<synchronous>, transform_indices = @transform_6, window_bounds = array<i64: 1, 128>}, {transform_indices = @transform_7, window_bounds = array<i64: 8, 128>}]} {
    %c0 = arith.constant 0 : index
    %c0_0 = arith.constant 0 : index
    %c0_1 = arith.constant 0 : index
    %0 = vector.load %arg1[%c0, %c0_0, %c0_1] : memref<8x2x8xf32, #tpu.memory_space<vmem>>, vector<8x1x8xf32>
    %c0_2 = arith.constant 0 : index
    %c1 = arith.constant 1 : index
    %c0_3 = arith.constant 0 : index
    %1 = vector.load %arg1[%c0_2, %c1, %c0_3] : memref<8x2x8xf32, #tpu.memory_space<vmem>>, vector<8x1x8xf32>
    %cst = arith.constant 0.000000e+00 : f32
    %2 = vector.broadcast %cst : f32 to vector<8x1x1xf32>
    %3 = vector.extract_strided_slice %1 {offsets = [0, 0, 0], sizes = [8, 1, 7], strides = [1, 1, 1]} : vector<8x1x8xf32> to vector<8x1x7xf32>
    %4 = tpu.concatenate %2, %3 in 2 : vector<8x1x1xf32>, vector<8x1x7xf32> -> vector<8x1x8xf32>
    %5 = vector.extract_strided_slice %0 {offsets = [0, 0, 1], sizes = [8, 1, 7], strides = [1, 1, 1]} : vector<8x1x8xf32> to vector<8x1x7xf32>
    %6 = tpu.concatenate %5, %2 in 2 : vector<8x1x7xf32>, vector<8x1x1xf32> -> vector<8x1x8xf32>
    %cst_4 = arith.constant 0.000000e+00 : f32
    %7 = vector.broadcast %cst_4 : f32 to vector<8x4x8xf32>
    %8 = tpu.concatenate %4, %0, %1, %6, %7 in 1 : vector<8x1x8xf32>, vector<8x1x8xf32>, vector<8x1x8xf32>, vector<8x1x8xf32>, vector<8x4x8xf32> -> vector<8x8x8xf32>
    %9 = tpu.transpose %8, [0, 2, 1] : vector<8x8x8xf32> -> vector<8x8x8xf32>
    %10 = arith.truncf %9 : vector<8x8x8xf32> to vector<8x8x8xbf16>
    %c0_5 = arith.constant 0 : index
    %c0_6 = arith.constant 0 : index
    %11 = vector.load %arg2[%c0_5, %c0_6] : memref<8x256xf32, #tpu.memory_space<vmem>>, vector<8x256xf32>
    %12 = arith.truncf %11 : vector<8x256xf32> to vector<8x256xbf16>
    "tpu.trace_start"() <{level = 10 : i32, message = "blt,tc->blc"}> : () -> ()
    %cst_7 = arith.constant dense<0.000000e+00> : vector<8x8x256xf32>
    %13 = tpu.matmul %10, %12, %cst_7 {dimension_numbers = #tpu.dot_dimension_numbers<[2], [0], [0, 1], [1], [0, 0, 0, 1, 1, 1], [], []>} : vector<8x8x8xbf16>, vector<8x256xbf16>, vector<8x8x256xf32> -> vector<8x8x256xf32>
    "tpu.trace_stop"() : () -> ()
    %c0_8 = arith.constant 0 : index
    %c0_9 = arith.constant 0 : index
    %14 = vector.load %arg3[%c0_8, %c0_9] : memref<1x256xf32, #tpu.memory_space<vmem>>, vector<1x256xf32>
    %15 = vector.shape_cast %14 : vector<1x256xf32> to vector<1x1x256xf32>
    %16 = vector.broadcast %15 : vector<1x1x256xf32> to vector<8x8x256xf32>
    %17 = arith.addf %13, %16 : vector<8x8x256xf32>
    %18 = vector.extract_strided_slice %17 {offsets = [0, 0, 0], sizes = [8, 8, 128], strides = [1, 1, 1]} : vector<8x8x256xf32> to vector<8x8x128xf32>
    %19 = vector.extract_strided_slice %17 {offsets = [0, 0, 128], sizes = [8, 8, 128], strides = [1, 1, 1]} : vector<8x8x256xf32> to vector<8x8x128xf32>
    %20 = arith.maximumf %18, %19 : vector<8x8x128xf32>
    %cst_10 = arith.constant 0.000000e+00 : f32
    %21 = vector.broadcast %cst_10 : f32 to vector<8x8x128xf32>
    %22 = arith.maximumf %20, %21 : vector<8x8x128xf32>
    %23 = arith.truncf %22 : vector<8x8x128xf32> to vector<8x8x128xbf16>
    %cst_11 = arith.constant 0.000000e+00 : bf16
    %24 = vector.broadcast %cst_11 : bf16 to vector<8x1x128xbf16>
    %25 = vector.extract_strided_slice %23 {offsets = [0, 0, 0], sizes = [8, 7, 128], strides = [1, 1, 1]} : vector<8x8x128xbf16> to vector<8x7x128xbf16>
    %26 = tpu.concatenate %24, %25 in 1 : vector<8x1x128xbf16>, vector<8x7x128xbf16> -> vector<8x8x128xbf16>
    %27 = vector.extract_strided_slice %23 {offsets = [0, 1, 0], sizes = [8, 7, 128], strides = [1, 1, 1]} : vector<8x8x128xbf16> to vector<8x7x128xbf16>
    %28 = tpu.concatenate %27, %24 in 1 : vector<8x7x128xbf16>, vector<8x1x128xbf16> -> vector<8x8x128xbf16>
    %29 = tpu.concatenate %26, %23, %28 in 2 : vector<8x8x128xbf16>, vector<8x8x128xbf16>, vector<8x8x128xbf16> -> vector<8x8x384xbf16>
    %c0_12 = arith.constant 0 : index
    %c0_13 = arith.constant 0 : index
    %30 = vector.load %arg4[%c0_12, %c0_13] : memref<384x128xbf16, #tpu.memory_space<vmem>>, vector<384x128xbf16>
    %31 = vector.shape_cast %29 : vector<8x8x384xbf16> to vector<64x384xbf16>
    %cst_14 = arith.constant dense<0.000000e+00> : vector<64x128xf32>
    %32 = tpu.matmul %31, %30, %cst_14 {dimension_numbers = #tpu.dot_dimension_numbers<[1], [0], [0], [1], [0, 0, 1, 1], [], []>} : vector<64x384xbf16>, vector<384x128xbf16>, vector<64x128xf32> -> vector<64x128xf32>
    %33 = vector.shape_cast %32 : vector<64x128xf32> to vector<8x8x128xf32>
    %cst_15 = arith.constant dense<0xFF800000> : vector<8x128xf32>
    %34 = vector.multi_reduction <maximumf>, %33, %cst_15 [1] : vector<8x8x128xf32> to vector<8x128xf32>
    %c0_16 = arith.constant 0 : index
    %c0_17 = arith.constant 0 : index
    %35 = vector.load %arg5[%c0_16, %c0_17] : memref<1x128xf32, #tpu.memory_space<vmem>>, vector<1x128xf32>
    %36 = vector.broadcast %35 : vector<1x128xf32> to vector<8x128xf32>
    %37 = arith.addf %34, %36 : vector<8x128xf32>
    %cst_18 = arith.constant 0.000000e+00 : f32
    %38 = vector.broadcast %cst_18 : f32 to vector<8x128xf32>
    %39 = arith.maximumf %37, %38 : vector<8x128xf32>
    %40 = arith.truncf %39 : vector<8x128xf32> to vector<8x128xbf16>
    %c0_19 = arith.constant 0 : index
    %c0_20 = arith.constant 0 : index
    %41 = vector.load %arg6[%c0_19, %c0_20] : memref<128x128xbf16, #tpu.memory_space<vmem>>, vector<128x128xbf16>
    %cst_21 = arith.constant dense<0.000000e+00> : vector<8x128xf32>
    %42 = tpu.matmul %40, %41, %cst_21 {dimension_numbers = #tpu.dot_dimension_numbers<[1], [0], [0], [1], [0, 0, 1, 1], [], []>} : vector<8x128xbf16>, vector<128x128xbf16>, vector<8x128xf32> -> vector<8x128xf32>
    %c0_22 = arith.constant 0 : index
    %c0_23 = arith.constant 0 : index
    %43 = vector.load %arg7[%c0_22, %c0_23] : memref<1x128xf32, #tpu.memory_space<vmem>>, vector<1x128xf32>
    %44 = vector.broadcast %43 : vector<1x128xf32> to vector<8x128xf32>
    %45 = arith.addf %42, %44 : vector<8x128xf32>
    %cst_24 = arith.constant dense<0xFF800000> : vector<8xf32>
    %46 = vector.multi_reduction <maximumf>, %45, %cst_24 [1] : vector<8x128xf32> to vector<8xf32>
    %47 = vector.shape_cast %46 : vector<8xf32> to vector<8x1xf32>
    %48 = vector.broadcast %47 : vector<8x1xf32> to vector<8x128xf32>
    %49 = arith.subf %45, %48 : vector<8x128xf32>
    %50 = math.exp %49 : vector<8x128xf32>
    %cst_25 = arith.constant dense<0.000000e+00> : vector<8xf32>
    %51 = vector.multi_reduction <add>, %50, %cst_25 [1] : vector<8x128xf32> to vector<8xf32>
    %52 = vector.shape_cast %51 : vector<8xf32> to vector<8x1xf32>
    %53 = math.log %52 : vector<8x1xf32>
    %54 = vector.broadcast %53 : vector<8x1xf32> to vector<8x128xf32>
    %55 = arith.subf %49, %54 : vector<8x128xf32>
    %c0_26 = arith.constant 0 : index
    %c0_27 = arith.constant 0 : index
    %56 = vector.load %arg8[%c0_26, %c0_27] : memref<8x128xf32, #tpu.memory_space<vmem>>, vector<8x128xf32>
    tpu.vector_store %arg8[%c0_26, %c0_27], %55 {strides = array<i32>} : memref<8x128xf32, #tpu.memory_space<vmem>>, vector<8x128xf32>,
    return
  }
  func.func @transform_0(%arg0: i32) -> (i32, i32, i32) {
    %c0_i32 = arith.constant 0 : i32
    %c0_i32_0 = arith.constant 0 : i32
    %c0_i32_1 = arith.constant 0 : i32
    return %arg0, %c0_i32, %c0_i32_0 : i32, i32, i32
  }
  func.func @transform_1(%arg0: i32) -> (i32, i32) {
    %c0_i32 = arith.constant 0 : i32
    %c0_i32_0 = arith.constant 0 : i32
    %c0_i32_1 = arith.constant 0 : i32
    return %c0_i32, %c0_i32_0 : i32, i32
  }
  func.func @transform_2(%arg0: i32) -> (i32, i32) {
    %c0_i32 = arith.constant 0 : i32
    %c0_i32_0 = arith.constant 0 : i32
    %c0_i32_1 = arith.constant 0 : i32
    return %c0_i32, %c0_i32_0 : i32, i32
  }
  func.func @transform_3(%arg0: i32) -> (i32, i32) {
    %c0_i32 = arith.constant 0 : i32
    %c0_i32_0 = arith.constant 0 : i32
    %c0_i32_1 = arith.constant 0 : i32
    return %c0_i32, %c0_i32_0 : i32, i32
  }
  func.func @transform_4(%arg0: i32) -> (i32, i32) {
    %c0_i32 = arith.constant 0 : i32
    %c0_i32_0 = arith.constant 0 : i32
    %c0_i32_1 = arith.constant 0 : i32
    return %c0_i32, %c0_i32_0 : i32, i32
  }
  func.func @transform_5(%arg0: i32) -> (i32, i32) {
    %c0_i32 = arith.constant 0 : i32
    %c0_i32_0 = arith.constant 0 : i32
    %c0_i32_1 = arith.constant 0 : i32
    return %c0_i32, %c0_i32_0 : i32, i32
  }
  func.func @transform_6(%arg0: i32) -> (i32, i32) {
    %c0_i32 = arith.constant 0 : i32
    %c0_i32_0 = arith.constant 0 : i32
    %c0_i32_1 = arith.constant 0 : i32
    return %c0_i32, %c0_i32_0 : i32, i32
  }
  func.func @transform_7(%arg0: i32) -> (i32, i32) {
    %c0_i32 = arith.constant 0 : i32
    %c0_i32_0 = arith.constant 0 : i32
    return %arg0, %c0_i32 : i32, i32
  }
}

</mosaic_0001>

<bundles_post_ra>
// kernel: tpu_custom_call.1
= control target key start
LH: loop header
LB: loop body
LE: loop exit
PB: predicated region body
PF: predicated region fallthrough
CT: control target
= control target key end

     0   :  { %12 = vsyncpa [#allocation3], 0  ;;  %s2174_s0 = inlined_call_operand.hbm [shape: f32[8,2,8], index: 0, kind: input, shape index: {}]   ;;  %s2175_s1 = inlined_call_operand.hbm [shape: f32[8,256], index: 1, kind: input, shape index: {}]   ;;  %s2176_s2 = inlined_call_operand.vmem [shape: f32[1,256], index: 2, kind: input, shape index: {}]   ;;  %s2177_s3 = inlined_call_operand.hbm [shape: bf16[384,128], index: 3, kind: input, shape index: {}]   ;;  %s2178_s4 = inlined_call_operand.vmem [shape: f32[1,128], index: 4, kind: input, shape index: {}]   ;;  %s2179_s5 = inlined_call_operand.hbm [shape: bf16[128,128], index: 5, kind: input, shape index: {}]   ;;  %s2180_s6 = inlined_call_operand.vmem [shape: f32[1,128], index: 6, kind: input, shape index: {}]   ;;  %s2181_s7 = inlined_call_operand.hbm [shape: f32[8,128], index: 7, kind: output, shape index: {}]  }
   0x1   :  { %13 = vsyncpa [#allocation6], 0 }
   0x2   :  { %14 = vsyncpa [#allocation9], 0 }
   0x3   :  { %15 = vsyncpa [#allocation4], 0  ;;  %s1852_s24 = smov [#allocation5]   ;;  %s1853_s26 = smov [#allocation2]  }
   0x4   :  { %s34_s25 = sshll.u32 %s1852_s24, 4  ;;  %s21_s27 = sshll.u32 %s1853_s26, 4  ;;  %s35_s25 = int_to_ptr.vmem [resolvable:$true] %s34_s25  ;;  %s1906_s27 = int_to_ptr.vmem [resolvable:$true] %s21_s27 }
   0x5   :  { %s1734_s30 = scalar_lea.hbm %s2175_s1, 256 }
   0x6   :  { %p1735_p0 = scmp.ne.s32.totalorder %s2175_s1, %s1734_s30  ;;  %p1738_p1 = scmp.lt.u32.totalorder %s1734_s30, %s2175_s1 }
   0x8   :  { %p1740_p2 = pnand %p1738_p1, %p1735_p0 }
   0xa   :  { %1743 = shalt.err (!%p1740_p2)
}
   0xb   :  { %s1744_s12 = scalar_lea.vmem %s35_s25, 256  ;;  %p1749_p4 = scmp.lt.s32.totalorder %s35_s25, %s35_s25 }
   0xc   :  { %p1745_p3 = scmp.ne.s32.totalorder %s35_s25, %s1744_s12  ;;  %p1750_p5 = scmp.lt.s32.totalorder %s1744_s12, %s1744_s12 }
   0xe   :  { %p1751_p6 = por %p1750_p5, %p1749_p4 }
  0x10   :  { %p1752_p7 = pnand %p1751_p6, %p1745_p3 }
  0x12   :  { %1755 = shalt.err (!%p1752_p7)
}
  0x13   :  { %37 = dma.hbm_to_vmem [thread:$0]  %s2175_s1, 256, %s35_s25, [#allocation6]  }
  0x14   :  { %s1756_s17 = scalar_lea.hbm %s2174_s0, 256 }
  0x15   :  { %p1757_p8 = scmp.ne.s32.totalorder %s2174_s0, %s1756_s17  ;;  %p1760_p9 = scmp.lt.u32.totalorder %s1756_s17, %s2174_s0 }
  0x17   :  { %p1762_p10 = pnand %p1760_p9, %p1757_p8 }
  0x19   :  { %1765 = shalt.err (!%p1762_p10)
}
  0x1a   :  { %s1766_s22 = scalar_lea.vmem %s1906_s27, 256  ;;  %p1771_p12 = scmp.lt.s32.totalorder %s1906_s27, %s1906_s27 }
  0x1b   :  { %p1767_p11 = scmp.ne.s32.totalorder %s1906_s27, %s1766_s22  ;;  %p1772_p13 = scmp.lt.s32.totalorder %s1766_s22, %s1766_s22 }
  0x1d   :  { %p1773_p0 = por %p1772_p13, %p1771_p12 }
  0x1f   :  { %p1774_p1 = pnand %p1773_p0, %p1767_p11 }
  0x21   :  { %1777 = shalt.err (!%p1774_p1)
}
  0x22   :  { %s1854_s1 = smov 32   ;;  %s1855_s23 = smov 2  }
  0x23   :  { %27 = dma.hbm_to_vmem [thread:$0]  %s2174_s0, 256, %s1906_s27, [#allocation3], %s1854_s1, %s1854_s1, %s1855_s23  }
  0x24   :  { %s1856_s26 = smov [#allocation7]   ;;  %s1778_s8 = scalar_lea.hbm %s2177_s3, 3072 }
  0x25   :  { %s45_s28 = sshll.u32 %s1856_s26, 4  ;;  %p1779_p2 = scmp.ne.s32.totalorder %s2177_s3, %s1778_s8  ;;  %s46_s28 = int_to_ptr.vmem [resolvable:$true] %s45_s28 }
  0x26   :  { %p1782_p3 = scmp.lt.u32.totalorder %s1778_s8, %s2177_s3 }
  0x28   :  { %p1784_p4 = pnand %p1782_p3, %p1779_p2 }
  0x2a   :  { %1787 = shalt.err (!%p1784_p4)
}
  0x2b   :  { %s1788_s13 = scalar_lea.vmem %s46_s28, 3072  ;;  %p1793_p6 = scmp.lt.s32.totalorder %s46_s28, %s46_s28 }
  0x2c   :  { %p1789_p5 = scmp.ne.s32.totalorder %s46_s28, %s1788_s13  ;;  %p1794_p7 = scmp.lt.s32.totalorder %s1788_s13, %s1788_s13 }
  0x2e   :  { %p1795_p8 = por %p1794_p7, %p1793_p6 }
  0x30   :  { %p1796_p9 = pnand %p1795_p8, %p1789_p5 }
  0x32   :  { %1799 = shalt.err (!%p1796_p9)
}
  0x33   :  { %s1857_s0 = smov 64   ;;  %s1858_s27 = smov 4  }
  0x34   :  { %51 = dma.hbm_to_vmem [thread:$0]  %s2177_s3, 3072, %s46_s28, [#allocation6], %s1857_s0, %s1857_s0, %s1858_s27  }
  0x35   :  { %s1859_s16 = smov [#allocation8]   ;;  %s1800_s20 = scalar_lea.hbm %s2179_s5, 1024 }
  0x36   :  { %s59_s17 = sshll.u32 %s1859_s16, 4  ;;  %p1801_p10 = scmp.ne.s32.totalorder %s2179_s5, %s1800_s20  ;;  %s60_s17 = int_to_ptr.vmem [resolvable:$true] %s59_s17 }
  0x37   :  { %p1804_p11 = scmp.lt.u32.totalorder %s1800_s20, %s2179_s5 }
  0x39   :  { %p1806_p12 = pnand %p1804_p11, %p1801_p10 }
  0x3b   :  { %1809 = shalt.err (!%p1806_p12)
}
  0x3c   :  { %s1810_s24 = scalar_lea.vmem %s60_s17, 1024  ;;  %p1815_p0 = scmp.lt.s32.totalorder %s60_s17, %s60_s17 }
  0x3d   :  { %p1811_p13 = scmp.ne.s32.totalorder %s60_s17, %s1810_s24  ;;  %p1816_p1 = scmp.lt.s32.totalorder %s1810_s24, %s1810_s24 }
  0x3f   :  { %p1817_p2 = por %p1816_p1, %p1815_p0 }
  0x41   :  { %p1818_p3 = pnand %p1817_p2, %p1811_p13 }
  0x43   :  { %1821 = shalt.err (!%p1818_p3)
}
  0x44   :  { %65 = dma.hbm_to_vmem [thread:$0]  %s2179_s5, 1024, %s60_s17, [#allocation9], %s1857_s0, %s1857_s0, %s1858_s27  }
  0x45   :  { %1844 = dma.done.wait [#allocation3], 256  }
  0x46   :  { %1845 = vsyncadd [#allocation3], 4294967040 }
  0x47   :  { %1846 = dma.done.wait [#allocation6], 3328  }
  0x48   :  { %1847 = vsyncadd [#allocation6], 4294963968 }
  0x49   :  { %1848 = dma.done.wait [#allocation9], 1024  }
  0x4a   :  { %1849 = vsyncadd [#allocation9], 4294966272  ;;  %v1961_v0 = vld [vmem:[#allocation2 + $0x1] sm:$0x1]  ;;  %v1963_v1 = vld [vmem:[#allocation2 + $0x3] sm:$0x1] }
  0x4b   :  { %v1965_v2 = vld [vmem:[#allocation2 + $0x5] sm:$0x1]  ;;  %v1630_v3 = vpack.i.bf16 %v1963_v1, %v1961_v0  ;;  %v1969_v4 = vld [vmem:[#allocation2 + $0x7] sm:$0x1]  ;;  %v81_v6 = vld [vmem:[#allocation2] sm:$0x1] }
  0x4c   :  { %v1640_v5 = vpack.i.bf16 %v1969_v4, %v1965_v2  ;;  %v82_v7 = vld [vmem:[#allocation2 + $0x2] sm:$0x1]  ;;  %s1860_s5 = smov 1   ;;  %v83_v9 = vld [vmem:[#allocation2 + $0x4] sm:$0x1]  ;;  %s1861_s26 = smov 127  }
  0x4d   :  { %1631 = vrot.lane.b32.xlu0 %v1630_v3, %s1860_s5  ;;  %v1635_v8 = vpack.i.bf16 %v82_v7, %v81_v6  ;;  %v84_v10 = vld [vmem:[#allocation2 + $0x6] sm:$0x1]  ;;  %v1973_v12 = vld [vmem:[#allocation2 + $0x8] sm:$0x1]  ;;  %v1975_v13 = vld [vmem:[#allocation2 + $0xa] sm:$0x1] }
  0x4e   :  { %1641 = vrot.lane.b32.xlu1 %v1640_v5, %s1860_s5  ;;  %v1645_v11 = vpack.i.bf16 %v84_v10, %v83_v9  ;;  %v1977_v14 = vld [vmem:[#allocation2 + $0x9] sm:$0x1]  ;;  %v1979_v15 = vld [vmem:[#allocation2 + $0xb] sm:$0x1]  ;;  %v1983_v17 = vld [vmem:[#allocation2 + $0xc] sm:$0x1]  ;;  %v1655_v20 = vpack.i.bf16 %v1975_v13, %v1973_v12 }
  0x4f   :  { %v1650_v16 = vpack.i.bf16 %v1979_v15, %v1977_v14  ;;  %v1985_v18 = vld [vmem:[#allocation2 + $0xe] sm:$0x1]  ;;  %v1987_v19 = vld [vmem:[#allocation2 + $0xd] sm:$0x1]  ;;  %v1991_v21 = vld [vmem:[#allocation2 + $0xf] sm:$0x1] }
  0x50   :  { %v1660_v22 = vpack.i.bf16 %v1991_v21, %v1987_v19  ;;  %v1665_v23 = vpack.i.bf16 %v1985_v18, %v1983_v17  ;;  %vm129_vm0 = vcmask 7168   ;;  %vm235_vm1 = vcmask 1040384   ;;  %s1865_s9 = smov [#allocation10]  }
  0x51   :  { %1636 = vrot.lane.b32.xlu0 %v1635_v8, %s1861_s26  ;;  %v196_v24 = vrot.slane %v1963_v1, 6  ;;  %v195_v25 = vrot.slane %v1961_v0, 6  ;;  %vm170_vm2 = vcmask 56320   ;;  %vm244_vm3 = vcmask 1041408   ;;  %s1437_s10 = sshll.u32 %s1865_s9, 4  ;;  %s1438_s10 = int_to_ptr.vmem [resolvable:$true] %s1437_s10 }
  0x52   :  { %1646 = vrot.lane.b32.xlu1 %v1645_v11, %s1861_s26  ;;  %v198_v26 = vrot.slane %v1969_v4, 6  ;;  %v197_v27 = vrot.slane %v1965_v2, 6  ;;  %v180_v28 = vrot.slane %v82_v7, 7  ;;  %v179_v29 = vrot.slane %v81_v6, 7  ;;  %p1827_p5 = scmp.lt.s32.totalorder %s1438_s10, %s1438_s10 }
  0x53   :  { %vm253_vm4 = vcmask 1042432   ;;  %v182_v30 = vrot.slane %v84_v10, 7  ;;  %v181_v31 = vrot.slane %v83_v9, 7  ;;  %v184_v32 = vrot.slane %v1975_v13, 7 }
  0x54   :  { %v183_v33 = vrot.slane %v1973_v12, 7  ;;  %vm262_vm5 = vcmask 1043456   ;;  %v200_v35 = vrot.slane %v1979_v15, 6  ;;  %v199_v36 = vrot.slane %v1977_v14, 6 }
  0x55   :  { %1651 = vrot.lane.b32.xlu0 %v1650_v16, %s1860_s5  ;;  %v186_v40 = vrot.slane %v1985_v18, 7  ;;  %v185_v41 = vrot.slane %v1983_v17, 7  ;;  %v202_v44 = vrot.slane %v1991_v21, 6  ;;  %v201_v45 = vrot.slane %v1987_v19, 6  ;;  %v1698_v21 = vld [vmem:[#allocation7 + $0x40] sm:$0xff]  }
  0x56   :  { %1656 = vrot.lane.b32.xlu1 %v1655_v20, %s1861_s26  ;;  %1511 = vmatprep.subr.bf16.mxu1 %v1698_v21  ;;  %vm571_vm6 = vcmask 64512   ;;  %vm787_vm7 = vsmask.f32 3328  ;;  %vm752_vm8 = vsmask.f32 256  ;;  %vm1864_vm11 = vmmov 0  }
  0x57   :  { %vm2095_vm9 = vmand %vm262_vm5, %vm787_vm7  ;;  %vm1310_vm12 = vcmask 1041409   ;;  %vm1313_vm13 = vcmask 1042434   ;;  %vm1316_vm14 = vcmask 1043459   ;;  %vm1319_vm15 = vcmask 1044484  }
  0x58   :  { %vm2100_vm10 = vmand %vm235_vm1, %vm752_vm8 }
  0x59   :  { %1661 = vrot.lane.b32.xlu0 %v1660_v22, %s1860_s5 }
  0x5a   :  { %1666 = vrot.lane.b32.xlu1 %v1665_v23, %s1861_s26 }
  0xbf   :  { %v1632_v34 = vpop.permute.xlu0 %1631 }
  0xc0   :  { %v1634_v37 = vunpack.i.h.bf16 %v1632_v34  ;;  %v1633_v38 = vunpack.i.l.bf16 %v1632_v34  ;;  %v1642_v39 = vpop.permute.xlu1 %1641 }
  0xc1   :  { %v1644_v42 = vunpack.i.h.bf16 %v1642_v39  ;;  %v1643_v43 = vunpack.i.l.bf16 %v1642_v39 }
  0xc2   :  { %v131_v46 = vsel %vm129_vm0, 0.0, %v1634_v37  ;;  %v130_v47 = vsel %vm129_vm0, 0.0, %v1633_v38 }
  0xc3   :  { %v236_v48 = vsel %vm235_vm1, %v130_v47, %v179_v29  ;;  %v237_v49 = vsel %vm235_vm1, %v131_v46, %v180_v28  ;;  %v133_v50 = vsel %vm129_vm0, 0.0, %v1644_v42  ;;  %v132_v51 = vsel %vm129_vm0, 0.0, %v1643_v43  ;;  %v1637_v52 = vpop.permute.xlu0 %1636  ;;  %v536_v46 = vld [vmem:[#allocation5 + $0x8] sm:$0xff] }
  0xc4   :  { %v238_v53 = vsel %vm235_vm1, %v132_v51, %v181_v31  ;;  %v239_v54 = vsel %vm235_vm1, %v133_v50, %v182_v30  ;;  %v1639_v55 = vunpack.i.h.bf16 %v1637_v52  ;;  %v1638_v56 = vunpack.i.l.bf16 %v1637_v52  ;;  %v1647_v57 = vpop.permute.xlu1 %1646 }
  0xc5   :  { %v1649_v58 = vunpack.i.h.bf16 %v1647_v57  ;;  %v1648_v59 = vunpack.i.l.bf16 %v1647_v57  ;;  %v245_v60 = vsel %vm244_vm3, %v236_v48, %v195_v25  ;;  %v246_v61 = vsel %vm244_vm3, %v237_v49, %v196_v24 }
  0xc6   :  { %v172_v62 = vsel %vm170_vm2, %v1639_v55, 0.0  ;;  %v171_v63 = vsel %vm170_vm2, %v1638_v56, 0.0  ;;  %v247_v0 = vsel %vm244_vm3, %v238_v53, %v197_v27  ;;  %v248_v1 = vsel %vm244_vm3, %v239_v54, %v198_v26 }
  0xc7   :  { %v220_v2 = vrot.slane %v172_v62, 5  ;;  %v219_v3 = vrot.slane %v171_v63, 5  ;;  %v174_v4 = vsel %vm170_vm2, %v1649_v58, 0.0  ;;  %v173_v5 = vsel %vm170_vm2, %v1648_v59, 0.0  ;;  %v1652_v6 = vpop.permute.xlu0 %1651  ;;  %v535_v59 = vld [vmem:[#allocation5] sm:$0xff] }
  0xc8   :  { %v222_v7 = vrot.slane %v174_v4, 5  ;;  %v221_v8 = vrot.slane %v173_v5, 5  ;;  %v1657_v9 = vpop.permute.xlu1 %1656  ;;  %v1654_v10 = vunpack.i.h.bf16 %v1652_v6  ;;  %v1653_v11 = vunpack.i.l.bf16 %v1652_v6  ;;  %v1700_v4 = vld [vmem:[#allocation7 + $0x48] sm:$0xff]   ;;  %v1703_v5 = vld [vmem:[#allocation7 + $0x80] sm:$0xff]  }
  0xc9   :  { %v254_v16 = vsel %vm253_vm4, %v245_v60, %v219_v3  ;;  %v255_v20 = vsel %vm253_vm4, %v246_v61, %v220_v2  ;;  %v1659_v22 = vunpack.i.h.bf16 %v1657_v9  ;;  %v1658_v23 = vunpack.i.l.bf16 %v1657_v9  ;;  %v1701_v6 = vld [vmem:[#allocation7 + $0x8] sm:$0xff]  }
  0xca   :  { %v263_v24 = vsel %vm262_vm5, %v254_v16, 0.0  ;;  %v264_v25 = vsel %vm262_vm5, %v255_v20, 0.0  ;;  %v256_v26 = vsel %vm253_vm4, %v247_v0, %v221_v8  ;;  %v257_v27 = vsel %vm253_vm4, %v248_v1, %v222_v7  ;;  %v1702_v7 = vld [vmem:[#allocation7 + $0x50] sm:$0xff]  }
  0xcb   :  { %v1670_v28 = vpack.i.bf16 %v264_v25, %v263_v24  ;;  %v265_v29 = vsel %vm262_vm5, %v256_v26, 0.0  ;;  %v266_v30 = vsel %vm262_vm5, %v257_v27, 0.0  ;;  %v176_v31 = vsel %vm170_vm2, %v1659_v22, 0.0  ;;  %v1662_v34 = vpop.permute.xlu0 %1661  ;;  %v1704_v8 = vld [vmem:[#allocation7 + $0x10] sm:$0xff]  }
  0xcc   :  { %v1677_v37 = vpack.i.bf16 %v266_v30, %v265_v29  ;;  %v224_v38 = vrot.slane %v176_v31, 5  ;;  %v175_v39 = vsel %vm170_vm2, %v1658_v23, 0.0  ;;  %v135_v42 = vsel %vm129_vm0, 0.0, %v1654_v10  ;;  %v1667_v43 = vpop.permute.xlu1 %1666 }
  0xcd   :  { %1671 = vxpose.xlu0.b32.start.end [1/1] (short) (narrow) %v1670_v28, 8  ;;  %v223_v47 = vrot.slane %v175_v39, 5  ;;  %v241_v48 = vsel %vm235_vm1, %v135_v42, %v184_v32  ;;  %v134_v49 = vsel %vm129_vm0, 0.0, %v1653_v11  ;;  %v1669_v50 = vunpack.i.h.bf16 %v1667_v43  ;;  %v1707_v39 = vld [vmem:[#allocation7 + $0x18] sm:$0xff]   ;;  %v1708_v42 = vld [vmem:[#allocation7 + $0x60] sm:$0xff]  }
  0xce   :  { %1678 = vxpose.xlu1.b32.start.end [1/1] (short) (narrow) %v1677_v37, 8  ;;  %v240_v51 = vsel %vm235_vm1, %v134_v49, %v183_v33  ;;  %v1668_v52 = vunpack.i.l.bf16 %v1667_v43  ;;  %v1664_v53 = vunpack.i.h.bf16 %v1662_v34  ;;  %v1663_v54 = vunpack.i.l.bf16 %v1662_v34  ;;  %v1705_v37 = vld [vmem:[#allocation7 + $0x58] sm:$0xff]   ;;  %v1709_v43 = vld [vmem:[#allocation7 + $0x90] sm:$0xff]   ;;  %v1713_v49 = vld [vmem:[#allocation7 + $0x28] sm:$0xff]  }
  0xcf   :  { %v178_v55 = vsel %vm170_vm2, %v1669_v50, 0.0  ;;  %v249_v56 = vsel %vm244_vm3, %v240_v51, %v199_v36  ;;  %v250_v13 = vsel %vm244_vm3, %v241_v48, %v200_v35  ;;  %v538_v32 = vpack.c.bf16 %v536_v46, %v536_v46  ;;  %v1710_v46 = vld [vmem:[#allocation7 + $0x20] sm:$0xff]   ;;  %v1712_v48 = vld [vmem:[#allocation7 + $0x98] sm:$0xff]   ;;  %v1714_v50 = vld [vmem:[#allocation7 + $0x70] sm:$0xff]  }
  0xd0   :  { %v226_v57 = vrot.slane %v178_v55, 5  ;;  %v177_v58 = vsel %vm170_vm2, %v1668_v52, 0.0  ;;  %v137_v12 = vsel %vm129_vm0, 0.0, %v1664_v53  ;;  %v136_v33 = vsel %vm129_vm0, 0.0, %v1663_v54  ;;  %v1715_v51 = vld [vmem:[#allocation7 + $0xa0] sm:$0xff]   ;;  %v1716_v52 = vld [vmem:[#allocation7 + $0x30] sm:$0xff]  }
  0xd1   :  { %v225_v60 = vrot.slane %v177_v58, 5  ;;  %v243_v14 = vsel %vm235_vm1, %v137_v12, %v186_v40  ;;  %v242_v15 = vsel %vm235_vm1, %v136_v33, %v185_v41  ;;  %v258_v35 = vsel %vm253_vm4, %v249_v56, %v223_v47  ;;  %1452 = vmatprep.subr.msk.bf16.mxu0 %vm262_vm5, %v538_v32  ;;  %v1711_v47 = vld [vmem:[#allocation7 + $0x68] sm:$0xff]   ;;  %v1717_v53 = vld [vmem:[#allocation7 + $0x78] sm:$0xff]   ;;  %v1720_v56 = vld [vmem:[#allocation7 + $0xb0] sm:$0xff]  }
  0xd2   :  { %v259_v36 = vsel %vm253_vm4, %v250_v13, %v224_v38  ;;  %v267_v61 = vsel %vm262_vm5, %v258_v35, 0.0  ;;  %v251_v62 = vsel %vm244_vm3, %v242_v15, %v201_v45  ;;  %v252_v18 = vsel %vm244_vm3, %v243_v14, %v202_v44  ;;  %v1699_v44 = vld [vmem:[#allocation7] sm:$0xff]   ;;  %v1706_v38 = vld [vmem:[#allocation7 + $0x88] sm:$0xff]   ;;  %v1719_v55 = vld [vmem:[#allocation7 + $0x38] sm:$0xff]  }
  0xd3   :  { %v268_v17 = vsel %vm262_vm5, %v259_v36, 0.0  ;;  %v260_v40 = vsel %vm253_vm4, %v251_v62, %v225_v60  ;;  %v261_v41 = vsel %vm253_vm4, %v252_v18, %v226_v57  ;;  %v537_v63 = vpack.c.bf16 %v535_v59, %v535_v59  ;;  %1512 = vmatpush3.bf16.msra.mxu1 %v1699_v44  ;;  %v1718_v54 = vld [vmem:[#allocation7 + $0xa8] sm:$0xff]   ;;  %v1721_v13 = vld [vmem:[#allocation7 + $0xb8] sm:$0xff]   ;;  %v539_v12 = vld [vmem:[%s2176_s2] sm:$0x3] }
  0xd4   :  { %v1684_v0 = vpack.i.bf16 %v268_v17, %v267_v61  ;;  %v269_v1 = vsel %vm262_vm5, %v260_v40, 0.0  ;;  %v270_v2 = vsel %vm262_vm5, %v261_v41, 0.0  ;;  %v1862_v45 = vmov 0   ;;  %1513 = vmatprep.subr.bf16.mxu1 %v1700_v4 }
  0xd5   :  { %v1691_v3 = vpack.i.bf16 %v270_v2, %v269_v1  ;;  %v585_v19 = vsel %vm262_vm5, %v537_v63, 0  ;;  %622 = vmatprep.mubr.bf16.mxu0 %v1862_v45  ;;  %v541_v32 = vlaneseq  ;;  %vm1322_vm0 = vcmask 1045509  }
  0xd6   :  { %1685 = vxpose.xlu0.b32.start.end [1/1] (short) (narrow) %v1684_v0, 8  ;;  %591 = vmatpush1.bf16.msra.mxu0 %v585_v19  ;;  %vm1325_vm1 = vcmask 1046534   ;;  %vm1328_vm2 = vcmask 1047559  }
  0xd7   :  { %1572 = vmatprep.subr.bf16.mxu0 %v1703_v5  ;;  %1514 = vmatpush3.bf16.msra.mxu1 %v1701_v6  ;;  %v542_v57 = vshrl.u32 %v541_v32, 7 }
  0xd8   :  { %1515 = vmatprep.subr.bf16.mxu1 %v1702_v7 }
  0xd9   :  { %v543_v58 = vsub.s32 0, %v542_v57  ;;  %v547_v33 = vsub.s32 1, %v542_v57 }
  0xda   :  { %1692 = vxpose.xlu0.b32.start.end [1/1] (short) (narrow) %v1691_v3, 8 }
  0xdb   :  { %1516 = vmatpush3.bf16.msra.mxu1 %v1704_v8  ;;  %v2082_v59 = vrot.slane %v539_v12, %v543_v58  ;;  %v2084_v60 = vrot.slane %v539_v12, %v547_v33 }
  0xdc   :  { %1517 = vmatprep.subr.bf16.mxu1 %v1705_v37 }
  0xdf   :  { %1518 = vmatpush3.bf16.msra.mxu1 %v1707_v39 }
  0xe0   :  { %1519 = vmatprep.subr.bf16.mxu1 %v1708_v42 }
  0xe3   :  { %1520 = vmatpush3.bf16.msra.mxu1 %v1710_v46 }
  0xe4   :  { %1521 = vmatprep.subr.bf16.mxu1 %v1711_v47 }
  0xe7   :  { %1522 = vmatpush3.bf16.msra.mxu1 %v1713_v49 }
  0xe8   :  { %1523 = vmatprep.subr.bf16.mxu1 %v1714_v50 }
  0xeb   :  { %1524 = vmatpush3.bf16.msra.mxu1 %v1716_v52 }
  0xec   :  { %1525 = vmatprep.subr.bf16.mxu1 %v1717_v53 }
  0xef   :  { %1526 = vmatpush3.bf16.msra.mxu1 %v1719_v55 }
 0x14d   :  { %v1672_v9 = vpop.trf.xlu0 }
 0x14e   :  { %v1676_v10 = vunpack.i.h.bf16 %v1672_v9  ;;  %v1673_v11 = vunpack.i.l.bf16 %v1672_v9  ;;  %v1679_v16 = vpop.trf.xlu1 }
 0x14f   :  { %v1683_v22 = vunpack.i.h.bf16 %v1679_v16  ;;  %v1680_v23 = vunpack.i.l.bf16 %v1679_v16 }
 0x150   :  { %v1503_v20 = vpack.c.bf16 %v1676_v10, %v1673_v11 }
 0x151   :  { %v1504_v24 = vpack.c.bf16 %v1683_v22, %v1680_v23 }
 0x152   :  { %1453 = vmatmul.mubr.msk.bf16.vlgmr.msra.gmra.mrb[0].mxu0 %vm571_vm6, %v1503_v20  ;;  %v1726_v20 = vld [vmem:[#allocation8 + $0x20] sm:$0xff]  }
 0x153   :  { %632 = vmatprep.mubr.bf16.mxu0 %v1862_v45  ;;  %1573 = vmatpush3.bf16.msra.mxu0 %v1703_v5 }
 0x154   :  { %1574 = vmatprep.subr.bf16.mxu0 %v1706_v38 }
 0x156   :  { %v1686_v25 = vpop.trf.xlu0 }
 0x157   :  { %v1690_v26 = vunpack.i.h.bf16 %v1686_v25  ;;  %v1687_v27 = vunpack.i.l.bf16 %v1686_v25  ;;  %1575 = vmatpush3.bf16.msra.mxu0 %v1706_v38 }
 0x158   :  { %1576 = vmatprep.subr.bf16.mxu0 %v1709_v43 }
 0x159   :  { %v1505_v29 = vpack.c.bf16 %v1690_v26, %v1687_v27 }
 0x15a   :  { %1454 = vmatmul.mubr.msk.bf16.gmra.mrb[4].mxu0 %vm571_vm6, %v1504_v24  ;;  %v1693_v28 = vpop.trf.xlu0 }
 0x15b   :  { %642 = vmatprep.mubr.bf16.mxu0 %v1862_v45  ;;  %v1697_v30 = vunpack.i.h.bf16 %v1693_v28  ;;  %v1694_v31 = vunpack.i.l.bf16 %v1693_v28  ;;  %1577 = vmatpush3.bf16.msra.mxu0 %v1709_v43  ;;  %v1724_v28 = vld [vmem:[#allocation8 + $0x10] sm:$0xff]  }
 0x15c   :  { %1578 = vmatprep.subr.bf16.mxu0 %v1712_v48 }
 0x15d   :  { %v1506_v34 = vpack.c.bf16 %v1697_v30, %v1694_v31 }
 0x15f   :  { %1579 = vmatpush3.bf16.msra.mxu0 %v1712_v48 }
 0x160   :  { %1580 = vmatprep.subr.bf16.mxu0 %v1715_v51 }
 0x162   :  { %1455 = vmatmul.mubr.msk.bf16.gmra.mrb[8].mxu0 %vm571_vm6, %v1505_v29 }
 0x163   :  { %652 = vmatprep.mubr.bf16.mxu0 %v1862_v45  ;;  %1581 = vmatpush3.bf16.msra.mxu0 %v1715_v51 }
 0x164   :  { %1582 = vmatprep.subr.bf16.mxu0 %v1718_v54 }
 0x167   :  { %1583 = vmatpush3.bf16.msra.mxu0 %v1718_v54 }
 0x168   :  { %1584 = vmatprep.subr.bf16.mxu0 %v1720_v56 }
 0x16a   :  { %1456 = vmatmul.mubr.msk.bf16.gmra.mrb[12].mxu0 %vm571_vm6, %v1506_v34 }
 0x16b   :  { %1585 = vmatpush3.bf16.msra.mxu0 %v1720_v56 }
 0x16c   :  { %1586 = vmatprep.subr.bf16.mxu0 %v1721_v13 }
 0x16f   :  { %1587 = vmatpush3.bf16.msra.mxu0 %v1721_v13 }
 0x225   :  { %v624_v14 = vpop.f32.mrb[0].mxu0 }
 0x226   :  { %v625_v15 = vadd.f32 %v624_v14, %v2082_v59  ;;  %v626_v35 = vpop.f32.mrb[1].mxu0 }
 0x227   :  { %v627_v36 = vadd.f32 %v626_v35, %v2084_v60  ;;  %v628_v61 = vpop.f32.mrb[2].mxu0 }
 0x228   :  { %v629_v62 = vadd.f32 %v628_v61, %v2082_v59  ;;  %v630_v18 = vpop.f32.mrb[3].mxu0 }
 0x229   :  { %v631_v17 = vadd.f32 %v630_v18, %v2084_v60  ;;  %v663_v40 = vmax.f32 %v625_v15, %v627_v36 }
 0x22b   :  { %v664_v41 = vmax.f32 %v629_v62, %v631_v17  ;;  %v671_v63 = vmax.f32 %v663_v40, 0.0 }
 0x22d   :  { %v634_v0 = vpop.f32.mrb[4].mxu0  ;;  %v672_v1 = vmax.f32 %v664_v41, 0.0  ;;  %v679_v2 = vpack.c.bf16 %v671_v63, %v671_v63 }
 0x22e   :  { %v635_v3 = vadd.f32 %v634_v0, %v2082_v59  ;;  %v636_v19 = vpop.f32.mrb[5].mxu0 }
 0x22f   :  { %v637_v45 = vadd.f32 %v636_v19, %v2084_v60  ;;  %v638_v21 = vpop.f32.mrb[6].mxu0  ;;  %v680_v44 = vpack.c.bf16 %v672_v1, %v672_v1  ;;  %v688_v4 = vshrl.u32 %v679_v2, 16  ;;  %v691_v5 = vshll.u32 %v679_v2, 16 }
 0x230   :  { %v639_v6 = vadd.f32 %v638_v21, %v2082_v59  ;;  %v640_v7 = vpop.f32.mrb[7].mxu0  ;;  %v1507_v8 = vpack.c.bf16 %v672_v1, %v671_v63 }
 0x231   :  { %v665_v9 = vmax.f32 %v635_v3, %v637_v45  ;;  %v641_v10 = vadd.f32 %v640_v7, %v2084_v60  ;;  %v690_v11 = vrot.slane %v688_v4, 7  ;;  %v695_v16 = vshrl.u32 %v680_v44, 16 }
 0x232   :  { %v698_v22 = vshll.u32 %v680_v44, 16  ;;  %v762_v23 = vrot.slane %v691_v5, 1  ;;  %1093 = vmatprep.mubr.bf16.mxu1 %v1507_v8 }
 0x233   :  { %v673_v24 = vmax.f32 %v665_v9, 0.0  ;;  %v666_v25 = vmax.f32 %v639_v6, %v641_v10  ;;  %v697_v26 = vrot.slane %v695_v16, 7  ;;  %v693_v27 = vor.u32 %v691_v5, %v690_v11 }
 0x234   :  { %v764_v29 = vrot.slane %v698_v22, 1  ;;  %v763_v30 = vor.u32 %v762_v23, %v688_v4 }
 0x235   :  { %v681_v31 = vpack.c.bf16 %v673_v24, %v673_v24  ;;  %v674_v34 = vmax.f32 %v666_v25, 0.0  ;;  %v644_v37 = vpop.f32.mrb[8].mxu0  ;;  %v700_v38 = vor.u32 %v698_v22, %v697_v26  ;;  %v754_v43 = vsel %vm2100_vm10, 0, %v693_v27 }
 0x236   :  { %v645_v39 = vadd.f32 %v644_v37, %v2082_v59  ;;  %v646_v42 = vpop.f32.mrb[9].mxu0  ;;  %v765_v46 = vor.u32 %v764_v29, %v695_v16  ;;  %v789_v47 = vsel %vm2095_vm9, %v763_v30, 0 }
 0x237   :  { %v702_v48 = vshrl.u32 %v681_v31, 16  ;;  %v705_v49 = vshll.u32 %v681_v31, 16  ;;  %v682_v50 = vpack.c.bf16 %v674_v34, %v674_v34  ;;  %v647_v51 = vadd.f32 %v646_v42, %v2084_v60  ;;  %v648_v52 = vpop.f32.mrb[10].mxu0 }
 0x238   :  { %v649_v53 = vadd.f32 %v648_v52, %v2082_v59  ;;  %v650_v54 = vpop.f32.mrb[11].mxu0  ;;  %v755_v55 = vsel %vm2100_vm10, 0, %v700_v38  ;;  %v790_v56 = vsel %vm2095_vm9, %v765_v46, 0  ;;  %v1508_v13 = vpack.c.bf16 %v674_v34, %v673_v24 }
 0x239   :  { %v766_v32 = vrot.slane %v705_v49, 1  ;;  %v709_v57 = vshrl.u32 %v682_v50, 16  ;;  %v712_v58 = vshll.u32 %v682_v50, 16  ;;  %v667_v12 = vmax.f32 %v645_v39, %v647_v51 }
 0x23a   :  { %v651_v33 = vadd.f32 %v650_v54, %v2084_v60  ;;  %v1457_v14 = vcombine.low %v754_v43, %v755_v55  ;;  %v1459_v15 = vcombine.low %v789_v47, %v790_v56  ;;  %v704_v35 = vrot.slane %v702_v48, 7 }
 0x23b   :  { %v767_v36 = vor.u32 %v766_v32, %v702_v48  ;;  %v768_v61 = vrot.slane %v712_v58, 1  ;;  %v675_v62 = vmax.f32 %v667_v12, 0.0  ;;  %v711_v18 = vrot.slane %v709_v57, 7 }
 0x23c   :  { %v668_v17 = vmax.f32 %v649_v53, %v651_v33  ;;  %1094 = vmatmul.mubr.bf16.vlgmr.msra.gmra.mrb[0].mxu1 %v1457_v14  ;;  %1588 = vmatprep.mubr.bf16.mxu0 %v1459_v15  ;;  %v707_v40 = vor.u32 %v705_v49, %v704_v35 }
 0x23d   :  { %v769_v41 = vor.u32 %v768_v61, %v709_v57  ;;  %v683_v63 = vpack.c.bf16 %v675_v62, %v675_v62  ;;  %1101 = vmatprep.mubr.bf16.mxu1 %v1508_v13  ;;  %v654_v0 = vpop.f32.mrb[12].mxu0  ;;  %v714_v1 = vor.u32 %v712_v58, %v711_v18  ;;  %v791_v2 = vsel %vm2095_vm9, %v767_v36, 0 }
 0x23e   :  { %v676_v3 = vmax.f32 %v668_v17, 0.0  ;;  %v655_v19 = vadd.f32 %v654_v0, %v2082_v59  ;;  %v656_v45 = vpop.f32.mrb[13].mxu0  ;;  %v756_v21 = vsel %vm2100_vm10, 0, %v707_v40  ;;  %v1863_v0 = vmov 0.0  }
 0x23f   :  { %v792_v44 = vsel %vm2095_vm9, %v769_v41, 0  ;;  %v716_v4 = vshrl.u32 %v683_v63, 16  ;;  %v719_v5 = vshll.u32 %v683_v63, 16  ;;  %v657_v6 = vadd.f32 %v656_v45, %v2084_v60  ;;  %v658_v7 = vpop.f32.mrb[14].mxu0  ;;  %v1722_v63 = vld [vmem:[#allocation8] sm:$0xff]   ;;  %1596 = vmatprep.subr.bf16.mxu1 %v1863_v0  ;;  %v1729_v45 = vld [vmem:[#allocation8 + $0x38] sm:$0xff]  }
 0x240   :  { %v684_v8 = vpack.c.bf16 %v676_v3, %v676_v3  ;;  %v659_v9 = vadd.f32 %v658_v7, %v2082_v59  ;;  %v660_v10 = vpop.f32.mrb[15].mxu0  ;;  %v757_v11 = vsel %vm2100_vm10, 0, %v714_v1  ;;  %v1462_v16 = vcombine.low %v791_v2, %v792_v44  ;;  %1597 = vmatpush3.bf16.msra.mxu1 %v1722_v63  ;;  %v1723_v1 = vld [vmem:[#allocation8 + $0x8] sm:$0xff]   ;;  %v1725_v2 = vld [vmem:[#allocation8 + $0x18] sm:$0xff]  }
 0x241   :  { %v669_v22 = vmax.f32 %v655_v19, %v657_v6  ;;  %v661_v23 = vadd.f32 %v660_v10, %v2084_v60  ;;  %v1460_v24 = vcombine.low %v756_v21, %v757_v11  ;;  %v1509_v25 = vpack.c.bf16 %v676_v3, %v675_v62  ;;  %1598 = vmatprep.subr.bf16.mxu1 %v1863_v0  ;;  %v1727_v3 = vld [vmem:[#allocation8 + $0x28] sm:$0xff]   ;;  %v1728_v19 = vld [vmem:[#allocation8 + $0x30] sm:$0xff]  }
 0x242   :  { %v723_v26 = vshrl.u32 %v684_v8, 16  ;;  %v726_v27 = vshll.u32 %v684_v8, 16  ;;  %1589 = vmatmul.mubr.bf16.vlgmr.msra.gmra.mrb[16].mxu0 %v1462_v16  ;;  %v718_v29 = vrot.slane %v716_v4, 7  ;;  %v770_v30 = vrot.slane %v719_v5, 1 }
 0x243   :  { %v677_v31 = vmax.f32 %v669_v22, 0.0  ;;  %v670_v34 = vmax.f32 %v659_v9, %v661_v23 }
 0x244   :  { %1102 = vmatmul.mubr.bf16.gmra.mrb[4].mxu1 %v1460_v24  ;;  %v721_v37 = vor.u32 %v719_v5, %v718_v29  ;;  %v725_v59 = vrot.slane %v723_v26, 7  ;;  %v771_v38 = vor.u32 %v770_v30, %v716_v4  ;;  %v772_v39 = vrot.slane %v726_v27, 1 }
 0x245   :  { %v685_v42 = vpack.c.bf16 %v677_v31, %v677_v31  ;;  %v678_v43 = vmax.f32 %v670_v34, 0.0  ;;  %1109 = vmatprep.mubr.bf16.mxu1 %v1509_v25  ;;  %1599 = vmatpush3.bf16.msra.mxu1 %v1723_v1 }
 0x246   :  { %v728_v46 = vor.u32 %v726_v27, %v725_v59  ;;  %v773_v47 = vor.u32 %v772_v39, %v723_v26  ;;  %v758_v51 = vsel %vm2100_vm10, 0, %v721_v37  ;;  %v793_v53 = vsel %vm2095_vm9, %v771_v38, 0  ;;  %1600 = vmatprep.subr.bf16.mxu1 %v1863_v0 }
 0x247   :  { %v730_v60 = vshrl.u32 %v685_v42, 16  ;;  %v733_v48 = vshll.u32 %v685_v42, 16  ;;  %v686_v49 = vpack.c.bf16 %v678_v43, %v678_v43  ;;  %v1510_v50 = vpack.c.bf16 %v678_v43, %v677_v31 }
 0x248   :  { %v759_v52 = vsel %vm2100_vm10, 0, %v728_v46  ;;  %v794_v54 = vsel %vm2095_vm9, %v773_v47, 0 }
 0x249   :  { %v737_v55 = vshrl.u32 %v686_v49, 16  ;;  %v740_v56 = vshll.u32 %v686_v49, 16  ;;  %v1463_v13 = vcombine.low %v758_v51, %v759_v52  ;;  %v1465_v32 = vcombine.low %v793_v53, %v794_v54  ;;  %1601 = vmatpush3.bf16.msra.mxu1 %v1724_v28 }
 0x24a   :  { %v732_v57 = vrot.slane %v730_v60, 7  ;;  %v774_v58 = vrot.slane %v733_v48, 1  ;;  %1602 = vmatprep.subr.bf16.mxu1 %v1863_v0 }
 0x24b   :  { %1592 = vmatprep.mubr.bf16.mxu0 %v1465_v32  ;;  %v739_v12 = vrot.slane %v737_v55, 7  ;;  %v776_v33 = vrot.slane %v740_v56, 1 }
 0x24c   :  { %1110 = vmatmul.mubr.bf16.gmra.mrb[8].mxu1 %v1463_v13  ;;  %v735_v14 = vor.u32 %v733_v48, %v732_v57  ;;  %v775_v15 = vor.u32 %v774_v58, %v730_v60 }
 0x24d   :  { %1117 = vmatprep.mubr.bf16.mxu1 %v1510_v50  ;;  %v742_v35 = vor.u32 %v740_v56, %v739_v12  ;;  %v777_v36 = vor.u32 %v776_v33, %v737_v55  ;;  %1603 = vmatpush3.bf16.msra.mxu1 %v1725_v2  ;;  %v2147_v55 = vld [vmem:[%s2178_s4] ss:$0 sm:$0xff] }
 0x24e   :  { %v760_v61 = vsel %vm2100_vm10, 0, %v735_v14  ;;  %v795_v18 = vsel %vm2095_vm9, %v775_v15, 0  ;;  %1604 = vmatprep.subr.bf16.mxu1 %v1863_v0 }
 0x24f   :  { %v761_v62 = vsel %vm2100_vm10, 0, %v742_v35  ;;  %v796_v17 = vsel %vm2095_vm9, %v777_v36, 0 }
 0x250   :  { %v1466_v40 = vcombine.low %v760_v61, %v761_v62  ;;  %v1468_v41 = vcombine.low %v795_v18, %v796_v17 }
 0x251   :  { %1605 = vmatpush3.bf16.msra.mxu1 %v1726_v20 }
 0x252   :  { %1593 = vmatmul.mubr.bf16.gmra.mrb[20].mxu0 %v1468_v41  ;;  %1606 = vmatprep.subr.bf16.mxu1 %v1863_v0 }
 0x254   :  { %1118 = vmatmul.mubr.bf16.gmra.mrb[12].mxu1 %v1466_v40 }
 0x255   :  { %1607 = vmatpush3.bf16.msra.mxu1 %v1727_v3  ;;  %1612 = vmatprep.mubr.msk.bf16.mxu1 %vm1864_vm11, %v1863_v0 }
 0x256   :  { %1608 = vmatprep.subr.bf16.mxu1 %v1863_v0 }
 0x259   :  { %1609 = vmatpush3.bf16.msra.mxu1 %v1728_v19 }
 0x25a   :  { %1610 = vmatprep.subr.bf16.mxu1 %v1863_v0 }
 0x25d   :  { %1611 = vmatpush3.bf16.msra.mxu1 %v1729_v45 }
 0x30f   :  { %v1527_v21 = vpop.f32.mrb[0].mxu1 }
 0x310   :  { %v1528_v44 = vpop.f32.mrb[1].mxu1 }
 0x311   :  { %v1529_v4 = vadd.f32 %v1528_v44, %v1527_v21  ;;  %v1530_v5 = vpop.f32.mrb[2].mxu1 }
 0x312   :  { %v1531_v6 = vpop.f32.mrb[3].mxu1 }
 0x313   :  { %v1532_v7 = vadd.f32 %v1531_v6, %v1530_v5 }
 0x315   :  { %v1590_v8 = vpop.f32.mrb[16].mxu0 }
 0x316   :  { %v1160_v9 = vpop.f32.mrb[17].mxu0 }
 0x317   :  { %v1533_v10 = vpop.f32.mrb[4].mxu1  ;;  %v1161_v11 = vadd.f32 %v1529_v4, %v1160_v9  ;;  %v1591_v16 = vpop.f32.mrb[18].mxu0 }
 0x318   :  { %v1534_v22 = vpop.f32.mrb[5].mxu1  ;;  %v1163_v23 = vpop.f32.mrb[19].mxu0 }
 0x319   :  { %v1535_v24 = vadd.f32 %v1534_v22, %v1533_v10  ;;  %v1191_v25 = vrot.slane %v1161_v11, 4  ;;  %v1536_v26 = vpop.f32.mrb[6].mxu1  ;;  %v1164_v27 = vadd.f32 %v1532_v7, %v1163_v23 }
 0x31a   :  { %v1537_v29 = vpop.f32.mrb[7].mxu1 }
 0x31b   :  { %v1169_v30 = vadd.f32 %v1590_v8, %v1535_v24  ;;  %v1192_v31 = vmax.f32 %v1161_v11, %v1191_v25  ;;  %v1538_v34 = vadd.f32 %v1537_v29, %v1536_v26  ;;  %v1197_v37 = vrot.slane %v1164_v27, 4 }
 0x31d   :  { %v1203_v59 = vrot.slane %v1169_v30, 4  ;;  %v1193_v38 = vrot.slane %v1192_v31, 2  ;;  %v1172_v39 = vadd.f32 %v1591_v16, %v1538_v34  ;;  %v1198_v42 = vmax.f32 %v1164_v27, %v1197_v37 }
 0x31f   :  { %v1204_v43 = vmax.f32 %v1169_v30, %v1203_v59  ;;  %v1194_v46 = vmax.f32 %v1192_v31, %v1193_v38  ;;  %v1209_v47 = vrot.slane %v1172_v39, 4  ;;  %v1199_v60 = vrot.slane %v1198_v42, 2  ;;  %v1539_v48 = vpop.f32.mrb[8].mxu1 }
 0x320   :  { %v1540_v49 = vpop.f32.mrb[9].mxu1 }
 0x321   :  { %v1205_v50 = vrot.slane %v1204_v43, 2  ;;  %v1195_v51 = vrot.slane %v1194_v46, 1  ;;  %v1210_v52 = vmax.f32 %v1172_v39, %v1209_v47  ;;  %v1200_v53 = vmax.f32 %v1198_v42, %v1199_v60  ;;  %v1542_v54 = vpop.f32.mrb[10].mxu1 }
 0x322   :  { %v1541_v56 = vadd.f32 %v1540_v49, %v1539_v48  ;;  %v1543_v13 = vpop.f32.mrb[11].mxu1 }
 0x323   :  { %v1206_v32 = vmax.f32 %v1204_v43, %v1205_v50  ;;  %v1196_v57 = vmax.f32 %v1194_v46, %v1195_v51  ;;  %v1211_v58 = vrot.slane %v1210_v52, 2  ;;  %v1201_v12 = vrot.slane %v1200_v53, 1 }
 0x324   :  { %v1544_v33 = vadd.f32 %v1543_v13, %v1542_v54 }
 0x325   :  { %v1207_v14 = vrot.slane %v1206_v32, 1  ;;  %v1246_v15 = vadd.f32 %v2147_v55, %v1196_v57  ;;  %v1212_v35 = vmax.f32 %v1210_v52, %v1211_v58  ;;  %v1202_v36 = vmax.f32 %v1200_v53, %v1201_v12  ;;  %v1594_v61 = vpop.f32.mrb[20].mxu0 }
 0x326   :  { %v1176_v62 = vpop.f32.mrb[21].mxu0 }
 0x327   :  { %v1208_v18 = vmax.f32 %v1206_v32, %v1207_v14  ;;  %v1254_v17 = vmax.f32 %v1246_v15, 0.0  ;;  %v1213_v40 = vrot.slane %v1212_v35, 1  ;;  %v1247_v41 = vadd.f32 %v2147_v55, %v1202_v36  ;;  %v1545_v63 = vpop.f32.mrb[12].mxu1  ;;  %v1595_v0 = vpop.f32.mrb[22].mxu0 }
 0x328   :  { %v1546_v1 = vpop.f32.mrb[13].mxu1  ;;  %v1177_v28 = vadd.f32 %v1541_v56, %v1176_v62  ;;  %v1179_v2 = vpop.f32.mrb[23].mxu0 }
 0x329   :  { %v1248_v20 = vadd.f32 %v2147_v55, %v1208_v18  ;;  %v1214_v3 = vmax.f32 %v1212_v35, %v1213_v40  ;;  %v1255_v19 = vmax.f32 %v1247_v41, 0.0  ;;  %v1548_v45 = vpop.f32.mrb[14].mxu1  ;;  %v1547_v21 = vadd.f32 %v1546_v1, %v1545_v63 }
 0x32a   :  { %v1215_v44 = vrot.slane %v1177_v28, 4  ;;  %v1549_v4 = vpop.f32.mrb[15].mxu1  ;;  %v1180_v5 = vadd.f32 %v1544_v33, %v1179_v2  ;;  %v1262_v7 = vpack.c.bf16 %v1254_v17, %v1254_v17 }
 0x32b   :  { %v1256_v6 = vmax.f32 %v1248_v20, 0.0  ;;  %v1249_v8 = vadd.f32 %v2147_v55, %v1214_v3  ;;  %v1263_v9 = vpack.c.bf16 %v1255_v19, %v1255_v19  ;;  %v1185_v10 = vadd.f32 %v1594_v61, %v1547_v21 }
 0x32c   :  { %v1216_v11 = vmax.f32 %v1177_v28, %v1215_v44  ;;  %v1550_v16 = vadd.f32 %v1549_v4, %v1548_v45  ;;  %v1221_v22 = vrot.slane %v1180_v5, 4  ;;  %v1301_v34 = vunpack.c.l.b16 %v1262_v7 }
 0x32d   :  { %v1264_v23 = vpack.c.bf16 %v1256_v6, %v1256_v6  ;;  %v1257_v24 = vmax.f32 %v1249_v8, 0.0  ;;  %v1302_v25 = vunpack.c.l.b16 %v1263_v9  ;;  %v1227_v26 = vrot.slane %v1185_v10, 4 }
 0x32e   :  { %v1217_v27 = vrot.slane %v1216_v11, 2  ;;  %v1188_v29 = vadd.f32 %v1595_v0, %v1550_v16  ;;  %v1222_v30 = vmax.f32 %v1180_v5, %v1221_v22 }
 0x32f   :  { %v1303_v31 = vunpack.c.l.b16 %v1264_v23  ;;  %v1265_v37 = vpack.c.bf16 %v1257_v24, %v1257_v24  ;;  %v1309_v59 = vrot.slane %v1302_v25, 7  ;;  %v1228_v38 = vmax.f32 %v1185_v10, %v1227_v26  ;;  %v1494_v10 = vld [vmem:[%s2180_s6] ss:$0 sm:$0xff]  ;;  %s1822_s6 = scalar_lea.vmem %s1438_s10, 128 }
 0x330   :  { %v1218_v39 = vmax.f32 %v1216_v11, %v1217_v27  ;;  %v1233_v42 = vrot.slane %v1188_v29, 4  ;;  %v1223_v43 = vrot.slane %v1222_v30, 2  ;;  %p1823_p4 = scmp.ne.s32.totalorder %s1438_s10, %s1822_s6  ;;  %p1828_p6 = scmp.lt.s32.totalorder %s1822_s6, %s1822_s6 }
 0x331   :  { %v1312_v46 = vrot.slane %v1303_v31, 6  ;;  %v1304_v47 = vunpack.c.l.b16 %v1265_v37  ;;  %v1311_v60 = vsel %vm1310_vm12, %v1309_v59, %v1301_v34  ;;  %v1229_v48 = vrot.slane %v1228_v38, 2 }
 0x332   :  { %v1219_v49 = vrot.slane %v1218_v39, 1  ;;  %v1234_v50 = vmax.f32 %v1188_v29, %v1233_v42  ;;  %v1224_v51 = vmax.f32 %v1222_v30, %v1223_v43  ;;  %p1829_p7 = por %p1828_p6, %p1827_p5 }
 0x333   :  { %v1315_v52 = vrot.slane %v1304_v47, 5  ;;  %v1314_v53 = vsel %vm1313_vm13, %v1312_v46, %v1311_v60  ;;  %v1230_v54 = vmax.f32 %v1228_v38, %v1229_v48 }
 0x334   :  { %v1220_v56 = vmax.f32 %v1218_v39, %v1219_v49  ;;  %v1235_v13 = vrot.slane %v1234_v50, 2  ;;  %v1225_v32 = vrot.slane %v1224_v51, 1  ;;  %p1830_p8 = pnand %p1829_p7, %p1823_p4 }
 0x335   :  { %v1317_v57 = vsel %vm1316_vm14, %v1315_v52, %v1314_v53  ;;  %v1231_v58 = vrot.slane %v1230_v54, 1 }
 0x336   :  { %v1250_v12 = vadd.f32 %v2147_v55, %v1220_v56  ;;  %v1236_v33 = vmax.f32 %v1234_v50, %v1235_v13  ;;  %v1226_v14 = vmax.f32 %v1224_v51, %v1225_v32 }
 0x337   :  { %v1232_v15 = vmax.f32 %v1230_v54, %v1231_v58 }
 0x338   :  { %v1258_v35 = vmax.f32 %v1250_v12, 0.0  ;;  %v1237_v36 = vrot.slane %v1236_v33, 1  ;;  %v1251_v61 = vadd.f32 %v2147_v55, %v1226_v14 }
 0x339   :  { %v1252_v62 = vadd.f32 %v2147_v55, %v1232_v15 }
 0x33a   :  { %v1266_v18 = vpack.c.bf16 %v1258_v35, %v1258_v35  ;;  %v1238_v17 = vmax.f32 %v1236_v33, %v1237_v36  ;;  %v1259_v40 = vmax.f32 %v1251_v61, 0.0 }
 0x33b   :  { %v1260_v41 = vmax.f32 %v1252_v62, 0.0 }
 0x33c   :  { %v1305_v63 = vunpack.c.l.b16 %v1266_v18  ;;  %v1253_v0 = vadd.f32 %v2147_v55, %v1238_v17  ;;  %v1267_v1 = vpack.c.bf16 %v1259_v40, %v1259_v40 }
 0x33d   :  { %v1268_v28 = vpack.c.bf16 %v1260_v41, %v1260_v41 }
 0x33e   :  { %v1318_v2 = vrot.slane %v1305_v63, 4  ;;  %v1261_v20 = vmax.f32 %v1253_v0, 0.0  ;;  %v1306_v3 = vunpack.c.l.b16 %v1267_v1 }
 0x33f   :  { %v1307_v19 = vunpack.c.l.b16 %v1268_v28 }
 0x340   :  { %v1320_v45 = vsel %vm1319_vm15, %v1318_v2, %v1317_v57  ;;  %v1269_v21 = vpack.c.bf16 %v1261_v20, %v1261_v20  ;;  %v1321_v44 = vrot.slane %v1306_v3, 3 }
 0x341   :  { %v1324_v4 = vrot.slane %v1307_v19, 2 }
 0x342   :  { %v1308_v5 = vunpack.c.l.b16 %v1269_v21  ;;  %v1323_v6 = vsel %vm1322_vm0, %v1321_v44, %v1320_v45 }
 0x343   :  { %v1326_v8 = vsel %vm1325_vm1, %v1324_v4, %v1323_v6 }
 0x344   :  { %v1327_v7 = vrot.slane %v1308_v5, 1 }
 0x346   :  { %v1329_v9 = vsel %vm1328_vm2, %v1327_v7, %v1326_v8 }
 0x347   :  { %v1330_v55 = vpack.c.b16 %v1329_v9, %v1329_v9 }
 0x349   :  { %1613 = vmatmul.mubr.bf16.vlgmr.msra.gmra.mrb[16].mxu1 %v1330_v55 }
 0x41c   :  { %v1414_v11 = vpop.f32.mrb[16].mxu1 }
 0x41d   :  { %v1415_v16 = vadd.f32 %v1494_v10, %v1414_v11  ;;  %v1614_v22 = vpop.f32.mrb[17].mxu1 }
 0x41e   :  { %v1417_v23 = vpop.f32.mrb[18].mxu1 }
 0x41f   :  { %1420 = vmax.xlane.f32.xlu0 %v1415_v16  ;;  %v1615_v24 = vpop.f32.mrb[19].mxu1 }
 0x4ac   :  { %v1421_v25 = vpop.xlane.xlu0 %1420 }
 0x4ad   :  { %v1422_v26 = vsub.f32 %v1415_v16, %v1421_v25 }
 0x4af   :  { %v1423_v27 = vmul.f32 1.442695, %v1422_v26 }
 0x4b1   :  { %1730 = vpow2.f32 %v1423_v27 }
 0x4bb   :  { %v1731_v29 = vpop.eup %1730 }
 0x4bc   :  { %1425 = vadd.xlane.f32.xlu1 %v1731_v29 }
 0x549   :  { %v1426_v30 = vpop.xlane.xlu1 %1425 }
 0x54a   :  { %1732 = vlog2.f32 %v1426_v30 }
 0x554   :  { %v1733_v31 = vpop.eup %1732 }
 0x555   :  { %v1428_v34 = vmul.f32 0.6931472, %v1733_v31 }
 0x557   :  { %v1429_v37 = vsub.f32 %v1422_v26, %v1428_v34 }
 0x559   :  { %1430 = vst [vmem:[#allocation10] sm:$0xff] %v1429_v37 }
 0x55a   :  { %1833 = shalt.err (!%p1830_p8)
}
 0x55b   :  { %s1834_s13 = scalar_lea.hbm %s2181_s7, 128 }
 0x55c   :  { %p1835_p9 = scmp.ne.s32.totalorder %s2181_s7, %s1834_s13  ;;  %p1838_p10 = scmp.lt.u32.totalorder %s1834_s13, %s2181_s7 }
 0x55e   :  { %p1840_p11 = pnand %p1838_p10, %p1835_p9 }
 0x560   :  { %1843 = shalt.err (!%p1840_p11)
}
 0x561   :  { %1440 = dma.vmem_to_hbm [thread:$0]  %s1438_s10, 128, %s2181_s7, [#allocation4]  }
 0x562   :  { %1850 = dma.done.wait [#allocation4], 128  }
 0x563   :  { %1851 = vsyncadd [#allocation4], 4294967168 }
 0x564   :  { %1444 = vsyncpa [#allocation3], 1 }
 0x565   :  { %1445 = vsyncpa [#allocation6], 1 }
 0x566   :  { %1446 = vsyncpa [#allocation9], 1 }
 0x567   :  { %1447 = vsyncpa [#allocation4], 1 }

</bundles_post_ra>
